<compile_context>
chip_gen: v7x
topology: tpu7x:2x2x1
jax: 0.10.0
libtpu: 0.0.40
codegen_flags: <defaults>
</compile_context>

<pallas_src>
import functools

import jax
import jax.numpy as jnp
from jax.experimental import pallas as pl
from jax.experimental.pallas import tpu as pltpu

_LANES = 128  # vreg lane width; the batch axis is tiled in multiples of this.


# --------------------------------------------------------------------------
# Kernel
# --------------------------------------------------------------------------
def encoder_kernel(x_ref, w1_ref, b1_ref, w2_ref, b2_ref, w3_ref, b3_ref,
                   wh_ref, bh_ref, eps_ref, out_ref, *, latent_dim):
    """One batch tile, batch on the lane axis.

    x_ref:  [D_in, bt]     eps_ref: [L, bt]
    w*_ref: [out, in] (PyTorch layout), b*_ref: [out, 1]
    out_ref: [3L, bt]  rows = z | mu | log_var
    """
    mm_dtype = w1_ref.dtype  # bf16 weights -> bf16 MXU operands, f32 accumulate

    def dense(w_ref, a, b_ref):
        # [out, in] @ [in, bt] -> [out, bt]; f32 accumulation, f32 bias add.
        return (jnp.dot(w_ref[...], a.astype(mm_dtype),
                        preferred_element_type=jnp.float32) + b_ref[...])

    h = jnp.tanh(dense(w1_ref, x_ref[...], b1_ref))
    h = jnp.tanh(dense(w2_ref, h, b2_ref))
    h = jnp.tanh(dense(w3_ref, h, b3_ref))

    # Fused heads: single [2L, H2] @ [H2, bt] matmul, then sublane split.
    mulv = dense(wh_ref, h, bh_ref)          # [2L, bt]
    mu = mulv[:latent_dim, :]
    lv = mulv[latent_dim:, :]

    # Reparameterization exactly as the PyTorch module: sigma = 0.5*exp(logvar)
    sigma = 0.5 * jnp.exp(lv)
    z = mu + sigma * eps_ref[...].astype(jnp.float32)

    # Lane-dense packed output: three sublane-aligned, unmasked row stores.
    L = latent_dim
    out_ref[0 * L:1 * L, :] = z.astype(out_ref.dtype)
    out_ref[1 * L:2 * L, :] = mu.astype(out_ref.dtype)
    out_ref[2 * L:3 * L, :] = lv.astype(out_ref.dtype)


# --------------------------------------------------------------------------
# Per-generation helpers
# --------------------------------------------------------------------------
def _num_tensorcores():
    """Crude generation heuristic: v7x has 2 TensorCores per chip."""
    try:
        kind = jax.devices()[0].device_kind.lower()
    except Exception:
        return 1
    return 2 if ("v7" in kind or "7x" in kind) else 1


def _vmem_capacity_bytes():
    try:
        return int(pltpu.get_tpu_info().vmem_capacity_bytes)
    except Exception:
        return 64 * 1024 * 1024  # conservative fallback = v7x per-TC physical


def _round_up(x, m):
    return ((x + m - 1) // m) * m


def _pick_batch_tile(padded_batch):
    """Pick a batch tile (lane axis, multiple of 128) that divides padded_batch.

    v7x (2 TCs): keep >= 2 'parallel' grid steps so both TensorCores get work.
    v5e/v6e (1 TC): as few grid steps as possible (each costs ~0.35us of
    pipeline overhead), capped at 1024 batch lanes per tile.
    """
    n = padded_batch // _LANES
    min_steps = 2 if (_num_tensorcores() >= 2 and n >= 2) else 1
    min_steps = max(min_steps, -(-n // 8))            # tile <= 1024 lanes
    g = next(s for s in range(min_steps, n + 1) if n % s == 0)
    return (n // g) * _LANES


def _vmem_limit_bytes(prep, bt, x_itemsize):
    """Residency estimate; raise the scoped limit only when actually needed."""
    w_bytes = sum(int(prep[k].size) * prep[k].dtype.itemsize
                  for k in ("w1", "w2", "w3", "w_head"))
    b_bytes = sum(int(prep[k].size) * 4 for k in ("b1", "b2", "b3", "b_head"))
    d_in = prep["w1"].shape[1]
    latent = prep["w_head"].shape[0] // 2
    tile_bytes = bt * (d_in * x_itemsize + latent * 4 + 3 * latent * 4)
    # Pallas double-buffers every operand; add ~2 MiB compiler headroom.
    needed = 2 * (w_bytes + b_bytes + tile_bytes) + (2 << 20)
    if needed <= (16 << 20):      # fits the default scoped limit on every chip
        return None
    cap = int(0.75 * _vmem_capacity_bytes())  # leave room for Pallas scratch
    if needed > cap:
        # TODO(synk): stream w2/w3 over an 'arbitrary' K-reduction grid axis
        # instead of clamping once hidden dims outgrow ~75% of physical VMEM.
        return cap
    return needed


# --------------------------------------------------------------------------
# Parameter handling (one-time, outside the per-call hot path)
# --------------------------------------------------------------------------
def init_params(key, input_dim, hidden_dim, latent_dim):
    """Synthetic nn.Linear params in PyTorch layout: W [out, in], b [out, 1]."""
    h2 = hidden_dim // 2
    ks = jax.random.split(key, 10)

    def lin(kw, kb, fan_in, fan_out):
        bound = 1.0 / jnp.sqrt(fan_in)
        w = jax.random.uniform(kw, (fan_out, fan_in), jnp.float32, -bound, bound)
        b = jax.random.uniform(kb, (fan_out, 1), jnp.float32, -bound, bound)
        return w, b

    w1, b1 = lin(ks[0], ks[1], input_dim, hidden_dim)
    w2, b2 = lin(ks[2], ks[3], hidden_dim, hidden_dim)
    w3, b3 = lin(ks[4], ks[5], hidden_dim, h2)
    wmu, bmu = lin(ks[6], ks[7], h2, latent_dim)
    wlv, blv = lin(ks[8], ks[9], h2, latent_dim)
    return dict(w1=w1, b1=b1, w2=w2, b2=b2, w3=w3, b3=b3,
                wmu=wmu, bmu=bmu, wlv=wlv, blv=blv)


def prepare_params(params, weight_dtype=jnp.bfloat16):
    """Fuse the mu/log_var heads once and (optionally) cast weight matrices.

    bf16 weights are the production default on v5e/v6e/v7x (MXU-native,
    halves weight DMA + VMEM residency); biases stay f32 and the whole
    elementwise epilogue is f32 on every generation. Pass weight_dtype=None
    to keep f32 weights.
    """
    prep = dict(
        w1=params["w1"], b1=params["b1"],
        w2=params["w2"], b2=params["b2"],
        w3=params["w3"], b3=params["b3"],
        w_head=jnp.concatenate([params["wmu"], params["wlv"]], axis=0),  # [2L,H2]
        b_head=jnp.concatenate([params["bmu"], params["blv"]], axis=0),  # [2L,1]
    )
    if weight_dtype is not None:
        for k in ("w1", "w2", "w3", "w_head"):
            prep[k] = prep[k].astype(weight_dtype)
    return prep


# --------------------------------------------------------------------------
# Forward passes
# --------------------------------------------------------------------------
def encoder_forward_packed(x_t, prep, eps_t, *, batch_tile=None):
    """Production path: no wrapper-side pad/concat/slice ops.

    x_t: [D_in, Bp] f32, eps_t: [L, Bp] f32 with Bp a multiple of 128.
    Returns packed [3L, Bp] f32, rows = z | mu | log_var (batch on lanes).
    """
    d_in, bp = x_t.shape
    h = prep["w1"].shape[0]
    h2 = prep["w3"].shape[0]
    two_l = prep["w_head"].shape[0]
    latent = two_l // 2

    if bp % _LANES:
        raise ValueError(f"batch ({bp}) must be a multiple of {_LANES}")
    bt = batch_tile if batch_tile is not None else _pick_batch_tile(bp)
    if bp % bt or bt % _LANES:
        raise ValueError(f"batch_tile {bt} must be a 128-multiple dividing {bp}")
    grid = (bp // bt,)

    def resident(shape):
        # Same block every grid step -> stays VMEM resident across the batch
        # loop.  (Weights are tiny here; once hidden dims grow, single-buffer
        # them via pipeline_mode=pl.Buffered(1) to halve their footprint.)
        return pl.BlockSpec(shape, lambda i: (0, 0))

    def batched(feat):
        return pl.BlockSpec((feat, bt), lambda i: (0, i))

    in_specs = [
        batched(d_in),                               # x (transposed)
        resident((h, d_in)), resident((h, 1)),       # dense1
        resident((h, h)), resident((h, 1)),          # dense2
        resident((h2, h)), resident((h2, 1)),        # dense3
        resident((two_l, h2)), resident((two_l, 1)), # fused mu|logvar heads
        batched(latent),                             # eps (transposed)
        # NOTE: eps could be generated in-kernel with pltpu.prng_* to drop one
        # input DMA stream, but that would change the numerics contract.
    ]
    out_specs = batched(3 * latent)
    out_shape = jax.ShapeDtypeStruct((3 * latent, bp), jnp.float32)

    return pl.pallas_call(
        functools.partial(encoder_kernel, latent_dim=latent),
        out_shape=out_shape,
        grid_spec=pl.GridSpec(grid=grid, in_specs=in_specs,
                              out_specs=out_specs),
        compiler_params=pltpu.CompilerParams(
            dimension_semantics=("parallel",),
            vmem_limit_bytes=_vmem_limit_bytes(prep, bt, x_t.dtype.itemsize)),
    )(x_t, prep["w1"], prep["b1"], prep["w2"], prep["b2"],
      prep["w3"], prep["b3"], prep["w_head"], prep["b_head"], eps_t)


def encoder_forward(x, prep, eps, *, batch_tile=None):
    """Convenience wrapper with the PyTorch interface: x [B, D_in], eps [B, L].

    Returns (z, mu, log_var), each [B, L].  The transpose/slice plumbing here
    is layout glue for the module-style API; latency-critical callers should
    use encoder_forward_packed directly with pre-transposed inputs.
    """
    batch = x.shape[0]
    latent = prep["w_head"].shape[0] // 2
    bp = _round_up(batch, _LANES)
    x_t, eps_t = x.T, eps.T
    if bp != batch:
        # Padded rows only see bias-only values through tanh/exp -> finite.
        x_t = jnp.pad(x_t, ((0, 0), (0, bp - batch)))
        eps_t = jnp.pad(eps_t, ((0, 0), (0, bp - batch)))
    packed = encoder_forward_packed(x_t, prep, eps_t, batch_tile=batch_tile)
    z = packed[0 * latent:1 * latent, :batch].T
    mu = packed[1 * latent:2 * latent, :batch].T
    lv = packed[2 * latent:3 * latent, :batch].T
    return z, mu, lv


# --------------------------------------------------------------------------
# Pure-JAX reference (same mixed-precision contract as the kernel)
# --------------------------------------------------------------------------
def encoder_ref(x, prep, eps):
    latent = prep["w_head"].shape[0] // 2

    def dense(a, w, b):
        return (jnp.dot(a.astype(w.dtype), w.T,
                        preferred_element_type=jnp.float32) + b[:, 0])

    h = jnp.tanh(dense(x, prep["w1"], prep["b1"]))
    h = jnp.tanh(dense(h, prep["w2"], prep["b2"]))
    h = jnp.tanh(dense(h, prep["w3"], prep["b3"]))
    mulv = dense(h, prep["w_head"], prep["b_head"])
    mu, lv = mulv[:, :latent], mulv[:, latent:]
    z = mu + 0.5 * jnp.exp(lv) * eps
    return z, mu, lv


# --------------------------------------------------------------------------
if __name__ == "__main__":
    INPUT_DIM, HIDDEN_DIM, LATENT_DIM = 32, 64, 8
    BATCH = 256  # multiple of 128: no padding; 2 parallel grid steps on v7x

    key = jax.random.PRNGKey(0)
    k_x, k_p, k_eps = jax.random.split(key, 3)
    x = jax.random.normal(k_x, (BATCH, INPUT_DIM), jnp.float32)
    eps = jax.random.normal(k_eps, (BATCH, LATENT_DIM), jnp.float32)

    raw = init_params(k_p, INPUT_DIM, HIDDEN_DIM, LATENT_DIM)

    # --- f32 weights: tight correctness check --------------------------------
    prep32 = prepare_params(raw, weight_dtype=None)
    z, mu, lv = encoder_forward(x, prep32, eps)
    jax.block_until_ready((z, mu, lv))
    z_r, mu_r, lv_r = encoder_ref(x, prep32, eps)
    assert jnp.allclose(z, z_r, atol=1e-4, rtol=1e-4), "f32 z mismatch"
    assert jnp.allclose(mu, mu_r, atol=1e-4, rtol=1e-4), "f32 mu mismatch"
    assert jnp.allclose(lv, lv_r, atol=1e-4, rtol=1e-4), "f32 log_var mismatch"

    # --- bf16 weights (production default on v5e/v6e/v7x), f32 epilogue ------
    prep16 = prepare_params(raw, weight_dtype=jnp.bfloat16)
    z, mu, lv = encoder_forward(x, prep16, eps)
    jax.block_until_ready((z, mu, lv))
    z_r, mu_r, lv_r = encoder_ref(x, prep16, eps)
    assert jnp.allclose(z, z_r, atol=2e-2, rtol=2e-2), "bf16 z mismatch"
    assert jnp.allclose(mu, mu_r, atol=2e-2, rtol=2e-2), "bf16 mu mismatch"
    assert jnp.allclose(lv, lv_r, atol=2e-2, rtol=2e-2), "bf16 log_var mismatch"

    print("KERNEL_OK")
</pallas_src>

<mosaic_0001>
module attributes {stable_mosaic.version = 11 : i64} {
  func.func @encoder_kernel(%arg0: i32, %arg1: memref<32x256xf32, #tpu.memory_space<vmem>>, %arg2: memref<64x32xf32, #tpu.memory_space<vmem>>, %arg3: memref<64x1xf32, #tpu.memory_space<vmem>>, %arg4: memref<64x64xf32, #tpu.memory_space<vmem>>, %arg5: memref<64x1xf32, #tpu.memory_space<vmem>>, %arg6: memref<32x64xf32, #tpu.memory_space<vmem>>, %arg7: memref<32x1xf32, #tpu.memory_space<vmem>>, %arg8: memref<16x32xf32, #tpu.memory_space<vmem>>, %arg9: memref<16x1xf32, #tpu.memory_space<vmem>>, %arg10: memref<8x256xf32, #tpu.memory_space<vmem>>, %arg11: memref<24x256xf32, #tpu.memory_space<vmem>>) attributes {dimension_semantics = [#tpu.dimension_semantics<parallel>], iteration_bounds = array<i64: 1>, scalar_prefetch = 0 : i64, scratch_operands = 0 : i64, tpu.core_type = #tpu.core_type<tc>, window_params = [{transform_indices = @transform_0, window_bounds = array<i64: 32, 256>}, {pipeline_mode = #tpu.pipeline_mode<synchronous>, transform_indices = @transform_1, window_bounds = array<i64: 64, 32>}, {pipeline_mode = #tpu.pipeline_mode<synchronous>, transform_indices = @transform_2, window_bounds = array<i64: 64, 1>}, {pipeline_mode = #tpu.pipeline_mode<synchronous>, transform_indices = @transform_3, window_bounds = array<i64: 64, 64>}, {pipeline_mode = #tpu.pipeline_mode<synchronous>, transform_indices = @transform_4, window_bounds = array<i64: 64, 1>}, {pipeline_mode = #tpu.pipeline_mode<synchronous>, transform_indices = @transform_5, window_bounds = array<i64: 32, 64>}, {pipeline_mode = #tpu.pipeline_mode<synchronous>, transform_indices = @transform_6, window_bounds = array<i64: 32, 1>}, {pipeline_mode = #tpu.pipeline_mode<synchronous>, transform_indices = @transform_7, window_bounds = array<i64: 16, 32>}, {pipeline_mode = #tpu.pipeline_mode<synchronous>, transform_indices = @transform_8, window_bounds = array<i64: 16, 1>}, {transform_indices = @transform_9, window_bounds = array<i64: 8, 256>}, {transform_indices = @transform_10, window_bounds = array<i64: 24, 256>}]} {
    %c0 = arith.constant 0 : index
    %c0_0 = arith.constant 0 : index
    %0 = vector.load %arg1[%c0, %c0_0] : memref<32x256xf32, #tpu.memory_space<vmem>>, vector<32x256xf32>
    %c0_1 = arith.constant 0 : index
    %c0_2 = arith.constant 0 : index
    %1 = vector.load %arg2[%c0_1, %c0_2] : memref<64x32xf32, #tpu.memory_space<vmem>>, vector<64x32xf32>
    %cst = arith.constant dense<0.000000e+00> : vector<64x256xf32>
    %2 = tpu.matmul %1, %0, %cst {dimension_numbers = #tpu.dot_dimension_numbers<[1], [0], [0], [1], [0, 0, 1, 1], [], []>} : vector<64x32xf32>, vector<32x256xf32>, vector<64x256xf32> -> vector<64x256xf32>
    %c0_3 = arith.constant 0 : index
    %c0_4 = arith.constant 0 : index
    %3 = vector.load %arg3[%c0_3, %c0_4] : memref<64x1xf32, #tpu.memory_space<vmem>>, vector<64x1xf32>
    %4 = vector.broadcast %3 : vector<64x1xf32> to vector<64x256xf32>
    %5 = arith.addf %2, %4 : vector<64x256xf32>
    %6 = math.tanh %5 : vector<64x256xf32>
    %c0_5 = arith.constant 0 : index
    %c0_6 = arith.constant 0 : index
    %7 = vector.load %arg4[%c0_5, %c0_6] : memref<64x64xf32, #tpu.memory_space<vmem>>, vector<64x64xf32>
    %cst_7 = arith.constant dense<0.000000e+00> : vector<64x256xf32>
    %8 = tpu.matmul %7, %6, %cst_7 {dimension_numbers = #tpu.dot_dimension_numbers<[1], [0], [0], [1], [0, 0, 1, 1], [], []>} : vector<64x64xf32>, vector<64x256xf32>, vector<64x256xf32> -> vector<64x256xf32>
    %c0_8 = arith.constant 0 : index
    %c0_9 = arith.constant 0 : index
    %9 = vector.load %arg5[%c0_8, %c0_9] : memref<64x1xf32, #tpu.memory_space<vmem>>, vector<64x1xf32>
    %10 = vector.broadcast %9 : vector<64x1xf32> to vector<64x256xf32>
    %11 = arith.addf %8, %10 : vector<64x256xf32>
    %12 = math.tanh %11 : vector<64x256xf32>
    %c0_10 = arith.constant 0 : index
    %c0_11 = arith.constant 0 : index
    %13 = vector.load %arg6[%c0_10, %c0_11] : memref<32x64xf32, #tpu.memory_space<vmem>>, vector<32x64xf32>
    %cst_12 = arith.constant dense<0.000000e+00> : vector<32x256xf32>
    %14 = tpu.matmul %13, %12, %cst_12 {dimension_numbers = #tpu.dot_dimension_numbers<[1], [0], [0], [1], [0, 0, 1, 1], [], []>} : vector<32x64xf32>, vector<64x256xf32>, vector<32x256xf32> -> vector<32x256xf32>
    %c0_13 = arith.constant 0 : index
    %c0_14 = arith.constant 0 : index
    %15 = vector.load %arg7[%c0_13, %c0_14] : memref<32x1xf32, #tpu.memory_space<vmem>>, vector<32x1xf32>
    %16 = vector.broadcast %15 : vector<32x1xf32> to vector<32x256xf32>
    %17 = arith.addf %14, %16 : vector<32x256xf32>
    %18 = math.tanh %17 : vector<32x256xf32>
    %c0_15 = arith.constant 0 : index
    %c0_16 = arith.constant 0 : index
    %19 = vector.load %arg8[%c0_15, %c0_16] : memref<16x32xf32, #tpu.memory_space<vmem>>, vector<16x32xf32>
    %cst_17 = arith.constant dense<0.000000e+00> : vector<16x256xf32>
    %20 = tpu.matmul %19, %18, %cst_17 {dimension_numbers = #tpu.dot_dimension_numbers<[1], [0], [0], [1], [0, 0, 1, 1], [], []>} : vector<16x32xf32>, vector<32x256xf32>, vector<16x256xf32> -> vector<16x256xf32>
    %c0_18 = arith.constant 0 : index
    %c0_19 = arith.constant 0 : index
    %21 = vector.load %arg9[%c0_18, %c0_19] : memref<16x1xf32, #tpu.memory_space<vmem>>, vector<16x1xf32>
    %22 = vector.broadcast %21 : vector<16x1xf32> to vector<16x256xf32>
    %23 = arith.addf %20, %22 : vector<16x256xf32>
    %24 = vector.extract_strided_slice %23 {offsets = [0, 0], sizes = [8, 256], strides = [1, 1]} : vector<16x256xf32> to vector<8x256xf32>
    %25 = vector.extract_strided_slice %23 {offsets = [8, 0], sizes = [8, 256], strides = [1, 1]} : vector<16x256xf32> to vector<8x256xf32>
    %26 = math.exp %25 : vector<8x256xf32>
    %cst_20 = arith.constant 5.000000e-01 : f32
    %27 = vector.broadcast %cst_20 : f32 to vector<8x256xf32>
    %28 = arith.mulf %27, %26 : vector<8x256xf32>
    %c0_21 = arith.constant 0 : index
    %c0_22 = arith.constant 0 : index
    %29 = vector.load %arg10[%c0_21, %c0_22] : memref<8x256xf32, #tpu.memory_space<vmem>>, vector<8x256xf32>
    %30 = arith.mulf %28, %29 : vector<8x256xf32>
    %31 = arith.addf %24, %30 : vector<8x256xf32>
    %c0_23 = arith.constant 0 : index
    %c0_24 = arith.constant 0 : index
    %32 = vector.load %arg11[%c0_23, %c0_24] : memref<24x256xf32, #tpu.memory_space<vmem>>, vector<8x256xf32>
    tpu.vector_store %arg11[%c0_23, %c0_24], %31 {strides = array<i32>} : memref<24x256xf32, #tpu.memory_space<vmem>>, vector<8x256xf32>,
    %c8 = arith.constant 8 : index
    %c0_25 = arith.constant 0 : index
    %33 = vector.load %arg11[%c8, %c0_25] : memref<24x256xf32, #tpu.memory_space<vmem>>, vector<8x256xf32>
    tpu.vector_store %arg11[%c8, %c0_25], %24 {strides = array<i32>} : memref<24x256xf32, #tpu.memory_space<vmem>>, vector<8x256xf32>,
    %c16 = arith.constant 16 : index
    %c0_26 = arith.constant 0 : index
    %34 = vector.load %arg11[%c16, %c0_26] : memref<24x256xf32, #tpu.memory_space<vmem>>, vector<8x256xf32>
    tpu.vector_store %arg11[%c16, %c0_26], %25 {strides = array<i32>} : memref<24x256xf32, #tpu.memory_space<vmem>>, vector<8x256xf32>,
    return
  }
  func.func @transform_0(%arg0: i32) -> (i32, i32) {
    %c0_i32 = arith.constant 0 : i32
    %c0_i32_0 = arith.constant 0 : i32
    return %c0_i32, %arg0 : i32, i32
  }
  func.func @transform_1(%arg0: i32) -> (i32, i32) {
    %c0_i32 = arith.constant 0 : i32
    %c0_i32_0 = arith.constant 0 : i32
    %c0_i32_1 = arith.constant 0 : i32
    return %c0_i32, %c0_i32_0 : i32, i32
  }
  func.func @transform_2(%arg0: i32) -> (i32, i32) {
    %c0_i32 = arith.constant 0 : i32
    %c0_i32_0 = arith.constant 0 : i32
    %c0_i32_1 = arith.constant 0 : i32
    return %c0_i32, %c0_i32_0 : i32, i32
  }
  func.func @transform_3(%arg0: i32) -> (i32, i32) {
    %c0_i32 = arith.constant 0 : i32
    %c0_i32_0 = arith.constant 0 : i32
    %c0_i32_1 = arith.constant 0 : i32
    return %c0_i32, %c0_i32_0 : i32, i32
  }
  func.func @transform_4(%arg0: i32) -> (i32, i32) {
    %c0_i32 = arith.constant 0 : i32
    %c0_i32_0 = arith.constant 0 : i32
    %c0_i32_1 = arith.constant 0 : i32
    return %c0_i32, %c0_i32_0 : i32, i32
  }
  func.func @transform_5(%arg0: i32) -> (i32, i32) {
    %c0_i32 = arith.constant 0 : i32
    %c0_i32_0 = arith.constant 0 : i32
    %c0_i32_1 = arith.constant 0 : i32
    return %c0_i32, %c0_i32_0 : i32, i32
  }
  func.func @transform_6(%arg0: i32) -> (i32, i32) {
    %c0_i32 = arith.constant 0 : i32
    %c0_i32_0 = arith.constant 0 : i32
    %c0_i32_1 = arith.constant 0 : i32
    return %c0_i32, %c0_i32_0 : i32, i32
  }
  func.func @transform_7(%arg0: i32) -> (i32, i32) {
    %c0_i32 = arith.constant 0 : i32
    %c0_i32_0 = arith.constant 0 : i32
    %c0_i32_1 = arith.constant 0 : i32
    return %c0_i32, %c0_i32_0 : i32, i32
  }
  func.func @transform_8(%arg0: i32) -> (i32, i32) {
    %c0_i32 = arith.constant 0 : i32
    %c0_i32_0 = arith.constant 0 : i32
    %c0_i32_1 = arith.constant 0 : i32
    return %c0_i32, %c0_i32_0 : i32, i32
  }
  func.func @transform_9(%arg0: i32) -> (i32, i32) {
    %c0_i32 = arith.constant 0 : i32
    %c0_i32_0 = arith.constant 0 : i32
    return %c0_i32, %arg0 : i32, i32
  }
  func.func @transform_10(%arg0: i32) -> (i32, i32) {
    %c0_i32 = arith.constant 0 : i32
    %c0_i32_0 = arith.constant 0 : i32
    return %c0_i32, %arg0 : i32, i32
  }
}

</mosaic_0001>

<bundles_post_ra>
// kernel: tpu_custom_call.1
= control target key start
LH: loop header
LB: loop body
LE: loop exit
PB: predicated region body
PF: predicated region fallthrough
CT: control target
= control target key end

     0   :  { %v917_v7 = vmov 0.0   ;;  %v918_v8 = vmov 0   ;;  %vm100_vm0 = vcmask 261120   ;;  %s1195_s0 = inlined_call_operand.vmem [shape: f32[32,256], index: 0, kind: input, shape index: {}]   ;;  %s1196_s1 = inlined_call_operand.vmem [shape: f32[64,32], index: 1, kind: input, shape index: {}]   ;;  %s1197_s2 = inlined_call_operand.vmem [shape: f32[64,1], index: 2, kind: input, shape index: {}]   ;;  %s1198_s3 = inlined_call_operand.vmem [shape: f32[64,64], index: 3, kind: input, shape index: {}]   ;;  %s1199_s4 = inlined_call_operand.vmem [shape: f32[64,1], index: 4, kind: input, shape index: {}]   ;;  %s1200_s5 = inlined_call_operand.vmem [shape: f32[32,64], index: 5, kind: input, shape index: {}]   ;;  %s1201_s6 = inlined_call_operand.vmem [shape: f32[32,1], index: 6, kind: input, shape index: {}]   ;;  %s1202_s7 = inlined_call_operand.vmem [shape: f32[16,32], index: 7, kind: input, shape index: {}]   ;;  %s1203_s8 = inlined_call_operand.vmem [shape: f32[16,1], index: 8, kind: input, shape index: {}]   ;;  %s1204_s9 = inlined_call_operand.vmem [shape: f32[8,256], index: 9, kind: input, shape index: {}]   ;;  %s1205_s10 = inlined_call_operand.hbm [shape: f32[24,256], index: 10, kind: output, shape index: {}]  }
   0x1   :  { %v37_v0 = vld [vmem:[%s1195_s0 + $0x8] sm:$0xff]  ;;  %v39_v1 = vld [vmem:[%s1195_s0 + $0x18] sm:$0xff]  ;;  %v36_v2 = vld [vmem:[%s1195_s0] sm:$0xff]  ;;  %189 = vmatprep.mubr.f32.mxu0 %v917_v7  ;;  %807 = vset.pattern.permute.xlu0 %v918_v8 }
   0x2   :  { %v754_v3 = vpack.c.bf16 %v39_v1, %v37_v0  ;;  %v38_v4 = vld [vmem:[%s1195_s0 + $0x10] sm:$0xff]  ;;  %v41_v5 = vld [vmem:[%s1195_s0 + $0x28] sm:$0xff]  ;;  %v43_v6 = vld [vmem:[%s1195_s0 + $0x38] sm:$0xff]  ;;  %808 = vset.pattern.permute.xlu1 %v918_v8  ;;  %399 = vmatprep.mubr.f32.mxu1 %v917_v7 }
   0x3   :  { %v756_v9 = vpack.c.bf16 %v38_v4, %v36_v2  ;;  %v758_v10 = vpack.c.bf16 %v43_v6, %v41_v5  ;;  %v40_v11 = vld [vmem:[%s1195_s0 + $0x20] sm:$0xff]  ;;  %v42_v12 = vld [vmem:[%s1195_s0 + $0x30] sm:$0xff]  ;;  %v53_v16 = vld [vmem:[%s1197_s2 + $0x8] sm:$0xff] }
   0x4   :  { %755 = vmatprep.subr.bf16.mxu0 %v754_v3  ;;  %v760_v13 = vpack.c.bf16 %v42_v12, %v40_v11  ;;  %v52_v14 = vld [vmem:[%s1197_s2] sm:$0xff]  ;;  %v54_v15 = vld [vmem:[%s1197_s2 + $0x10] sm:$0xff]  ;;  %v55_v17 = vld [vmem:[%s1197_s2 + $0x18] sm:$0xff] }
   0x5   :  { %757 = vmatpush1.bf16.msra.mxu0 %v756_v9  ;;  %62 = vperm.xlu0 %807, %v52_v14   ;;  %v44_v18 = vld [vmem:[%s1196_s1] sm:$0xff]  ;;  %v57_v20 = vld [vmem:[%s1197_s2 + $0x28] sm:$0xff] }
   0x6   :  { %759 = vmatprep.subr.bf16.mxu0 %v758_v10  ;;  %72 = vperm.xlu1 %808, %v54_v15   ;;  %v56_v19 = vld [vmem:[%s1197_s2 + $0x20] sm:$0xff]  ;;  %v45_v21 = vld [vmem:[%s1196_s1 + $0x8] sm:$0xff] }
   0x9   :  { %761 = vmatpush1.bf16.msra.mxu0 %v760_v13  ;;  %67 = vperm.xlu0 %807, %v53_v16  }
   0xa   :  { %77 = vperm.xlu1 %808, %v55_v17  }
   0xc   :  { %732 = vmatmul.mubr.msk.f32.vlgmr.msra.gmra.mrb[0].mxu0 %vm100_vm0, %v44_v18 }
   0xd   :  { %195 = vmatprep.mubr.f32.mxu0 %v917_v7 }
   0xe   :  { %15 = vsyncpa [#allocation3], 0  ;;  %82 = vperm.xlu0 %807, %v56_v19   ;;  %87 = vperm.xlu1 %808, %v57_v20   ;;  %v58_v22 = vld [vmem:[%s1197_s2 + $0x30] sm:$0xff]  ;;  %v59_v23 = vld [vmem:[%s1197_s2 + $0x38] sm:$0xff]  ;;  %vm310_vm1 = vcmask 523264   ;;  %s919_s23 = smov [#allocation2]  }
   0xf   :  { %v46_v24 = vld [vmem:[%s1196_s1 + $0x10] sm:$0xff]  ;;  %v262_v25 = vld [vmem:[%s1199_s4] sm:$0xff]  ;;  %v263_v26 = vld [vmem:[%s1199_s4 + $0x8] sm:$0xff]  ;;  %s721_s24 = sshll.u32 %s919_s23, 4  ;;  %s722_s24 = int_to_ptr.vmem [resolvable:$true] %s721_s24 }
  0x10   :  { %733 = vmatmul.mubr.msk.f32.gmra.mrb[2].mxu0 %vm100_vm0, %v45_v21  ;;  %v47_v27 = vld [vmem:[%s1196_s1 + $0x18] sm:$0xff]  ;;  %v264_v28 = vld [vmem:[%s1199_s4 + $0x10] sm:$0xff]  ;;  %v48_v30 = vld [vmem:[%s1196_s1 + $0x20] sm:$0xff]  ;;  %s893_s25 = scalar_lea.vmem %s722_s24, 768  ;;  %p898_p1 = scmp.lt.s32.totalorder %s722_s24, %s722_s24 }
  0x11   :  { %201 = vmatprep.mubr.f32.mxu0 %v917_v7  ;;  %v265_v29 = vld [vmem:[%s1199_s4 + $0x18] sm:$0xff]  ;;  %v266_v31 = vld [vmem:[%s1199_s4 + $0x20] sm:$0xff]  ;;  %v267_v32 = vld [vmem:[%s1199_s4 + $0x28] sm:$0xff]  ;;  %p894_p0 = scmp.ne.s32.totalorder %s722_s24, %s893_s25  ;;  %p899_p2 = scmp.lt.s32.totalorder %s893_s25, %s893_s25 }
  0x12   :  { %92 = vperm.xlu0 %807, %v58_v22   ;;  %97 = vperm.xlu1 %808, %v59_v23   ;;  %v49_v33 = vld [vmem:[%s1196_s1 + $0x28] sm:$0xff]  ;;  %v268_v34 = vld [vmem:[%s1199_s4 + $0x30] sm:$0xff]  ;;  %v269_v35 = vld [vmem:[%s1199_s4 + $0x38] sm:$0xff] }
  0x13   :  { %v50_v36 = vld [vmem:[%s1196_s1 + $0x30] sm:$0xff]  ;;  %v468_v37 = vld [vmem:[%s1201_s6] sm:$0xff]  ;;  %v469_v38 = vld [vmem:[%s1201_s6 + $0x8] sm:$0xff]  ;;  %p900_p3 = por %p899_p2, %p898_p1 }
  0x14   :  { %734 = vmatmul.mubr.msk.f32.gmra.mrb[4].mxu0 %vm100_vm0, %v46_v24  ;;  %v51_v39 = vld [vmem:[%s1196_s1 + $0x38] sm:$0xff]  ;;  %v470_v40 = vld [vmem:[%s1201_s6 + $0x10] sm:$0xff]  ;;  %v604_v42 = vld [vmem:[%s1203_s8 + $0x8] sm:$0xff] }
  0x15   :  { %207 = vmatprep.mubr.f32.mxu0 %v917_v7  ;;  %v471_v41 = vld [vmem:[%s1201_s6 + $0x18] sm:$0xff]  ;;  %v603_v43 = vld [vmem:[%s1203_s8] sm:$0xff]  ;;  %p901_p4 = pnand %p900_p3, %p894_p0 }
  0x16   :  { %272 = vperm.xlu0 %807, %v262_v25   ;;  %277 = vperm.xlu1 %808, %v263_v26  }
  0x18   :  { %735 = vmatmul.mubr.msk.f32.gmra.mrb[6].mxu0 %vm100_vm0, %v47_v27 }
  0x19   :  { %213 = vmatprep.mubr.f32.mxu0 %v917_v7 }
  0x1a   :  { %282 = vperm.xlu0 %807, %v264_v28   ;;  %287 = vperm.xlu1 %808, %v265_v29  }
  0x1c   :  { %736 = vmatmul.mubr.msk.f32.gmra.mrb[8].mxu0 %vm100_vm0, %v48_v30 }
  0x1d   :  { %219 = vmatprep.mubr.f32.mxu0 %v917_v7 }
  0x1e   :  { %292 = vperm.xlu0 %807, %v266_v31   ;;  %297 = vperm.xlu1 %808, %v267_v32  }
  0x20   :  { %737 = vmatmul.mubr.msk.f32.gmra.mrb[10].mxu0 %vm100_vm0, %v49_v33 }
  0x21   :  { %225 = vmatprep.mubr.f32.mxu0 %v917_v7 }
  0x22   :  { %302 = vperm.xlu0 %807, %v268_v34   ;;  %307 = vperm.xlu1 %808, %v269_v35  }
  0x24   :  { %738 = vmatmul.mubr.msk.f32.gmra.mrb[12].mxu0 %vm100_vm0, %v50_v36 }
  0x25   :  { %231 = vmatprep.mubr.f32.mxu0 %v917_v7 }
  0x26   :  { %474 = vperm.xlu0 %807, %v468_v37   ;;  %479 = vperm.xlu1 %808, %v469_v38  }
  0x28   :  { %739 = vmatmul.mubr.msk.f32.gmra.mrb[14].mxu0 %vm100_vm0, %v51_v39 }
  0x29   :  { %568 = vmatprep.mubr.f32.mxu0 %v917_v7 }
  0x2a   :  { %484 = vperm.xlu0 %807, %v470_v40   ;;  %489 = vperm.xlu1 %808, %v471_v41  }
  0x2e   :  { %612 = vperm.xlu0 %807, %v604_v42   ;;  %607 = vperm.xlu1 %808, %v603_v43  }
  0x84   :  { %v63_v44 = vpop.permute.xlu0 %62 }
  0x85   :  { %v73_v53 = vpop.permute.xlu1 %72 }
  0x88   :  { %v68_v49 = vpop.permute.xlu0 %67 }
  0x89   :  { %v78_v59 = vpop.permute.xlu1 %77 }
  0x8d   :  { %v83_v2 = vpop.permute.xlu0 %82  ;;  %v88_v12 = vpop.permute.xlu1 %87 }
  0x91   :  { %v93_v19 = vpop.permute.xlu0 %92  ;;  %v98_v28 = vpop.permute.xlu1 %97 }
  0xdf   :  { %v191_v45 = vpop.f32.mrb[0].mxu0 }
  0xe0   :  { %v192_v46 = vadd.f32 %v191_v45, %v63_v44  ;;  %v193_v47 = vpop.f32.mrb[1].mxu0  ;;  %v254_v45 = vld [vmem:[%s1198_s3] sm:$0xff] }
  0xe1   :  { %v194_v48 = vadd.f32 %v193_v47, %v63_v44  ;;  %v256_v47 = vld [vmem:[%s1198_s3 + $0x10] sm:$0xff] }
  0xe2   :  { %809 = vtanh.f32 %v192_v46  ;;  %v255_v46 = vld [vmem:[%s1198_s3 + $0x8] sm:$0xff] }
  0xe3   :  { %v197_v50 = vpop.f32.mrb[2].mxu0  ;;  %811 = vtanh.f32 %v194_v48  ;;  %v257_v48 = vld [vmem:[%s1198_s3 + $0x18] sm:$0xff] }
  0xe4   :  { %v198_v51 = vadd.f32 %v197_v50, %v68_v49  ;;  %v199_v52 = vpop.f32.mrb[3].mxu0  ;;  %v259_v50 = vld [vmem:[%s1198_s3 + $0x28] sm:$0xff] }
  0xe5   :  { %v200_v54 = vadd.f32 %v199_v52, %v68_v49  ;;  %v258_v49 = vld [vmem:[%s1198_s3 + $0x20] sm:$0xff]  ;;  %v261_v52 = vld [vmem:[%s1198_s3 + $0x38] sm:$0xff] }
  0xe6   :  { %813 = vtanh.f32 %v198_v51  ;;  %v260_v51 = vld [vmem:[%s1198_s3 + $0x30] sm:$0xff] }
  0xe7   :  { %815 = vtanh.f32 %v200_v54  ;;  %v203_v55 = vpop.f32.mrb[4].mxu0 }
  0xe8   :  { %v204_v56 = vadd.f32 %v203_v55, %v73_v53  ;;  %v205_v57 = vpop.f32.mrb[5].mxu0 }
  0xe9   :  { %v206_v58 = vadd.f32 %v205_v57, %v73_v53  ;;  %v273_v53 = vpop.permute.xlu0 %272 }
  0xea   :  { %817 = vtanh.f32 %v204_v56 }
  0xeb   :  { %v209_v60 = vpop.f32.mrb[6].mxu0  ;;  %819 = vtanh.f32 %v206_v58  ;;  %v278_v58 = vpop.permute.xlu1 %277 }
  0xec   :  { %v210_v61 = vadd.f32 %v209_v60, %v78_v59  ;;  %v211_v62 = vpop.f32.mrb[7].mxu0  ;;  %v810_v0 = vpop.eup %809 }
  0xed   :  { %v212_v63 = vadd.f32 %v211_v62, %v78_v59  ;;  %v812_v1 = vpop.eup %811 }
  0xee   :  { %821 = vtanh.f32 %v210_v61 }
  0xef   :  { %823 = vtanh.f32 %v212_v63  ;;  %v215_v3 = vpop.f32.mrb[8].mxu0  ;;  %v283_v63 = vpop.permute.xlu0 %282 }
  0xf0   :  { %v814_v4 = vpop.eup %813  ;;  %v216_v5 = vadd.f32 %v215_v3, %v83_v2  ;;  %v217_v6 = vpop.f32.mrb[9].mxu0 }
  0xf1   :  { %v816_v8 = vpop.eup %815  ;;  %v218_v9 = vadd.f32 %v217_v6, %v83_v2  ;;  %v764_v10 = vpack.c.bf16 %v814_v4, %v810_v0  ;;  %v288_v4 = vpop.permute.xlu1 %287 }
  0xf2   :  { %v762_v11 = vpack.c.bf16 %v816_v8, %v812_v1  ;;  %825 = vtanh.f32 %v216_v5 }
  0xf3   :  { %v221_v13 = vpop.f32.mrb[10].mxu0  ;;  %827 = vtanh.f32 %v218_v9 }
  0xf4   :  { %v222_v14 = vadd.f32 %v221_v13, %v88_v12  ;;  %v223_v15 = vpop.f32.mrb[11].mxu0  ;;  %763 = vmatprep.subr.bf16.mxu1 %v762_v11  ;;  %v818_v17 = vpop.eup %817 }
  0xf5   :  { %v224_v16 = vadd.f32 %v223_v15, %v88_v12  ;;  %765 = vmatpush1.bf16.msra.mxu1 %v764_v10  ;;  %v820_v18 = vpop.eup %819  ;;  %v293_v12 = vpop.permute.xlu0 %292 }
  0xf6   :  { %829 = vtanh.f32 %v222_v14 }
  0xf7   :  { %831 = vtanh.f32 %v224_v16  ;;  %v227_v20 = vpop.f32.mrb[12].mxu0 }
  0xf8   :  { %v822_v21 = vpop.eup %821  ;;  %v228_v22 = vadd.f32 %v227_v20, %v93_v19  ;;  %v229_v23 = vpop.f32.mrb[13].mxu0 }
  0xf9   :  { %v824_v24 = vpop.eup %823  ;;  %v230_v25 = vadd.f32 %v229_v23, %v93_v19  ;;  %v768_v26 = vpack.c.bf16 %v822_v21, %v818_v17  ;;  %v298_v21 = vpop.permute.xlu1 %297 }
  0xfa   :  { %v766_v27 = vpack.c.bf16 %v824_v24, %v820_v18  ;;  %833 = vtanh.f32 %v228_v22 }
  0xfb   :  { %v233_v29 = vpop.f32.mrb[14].mxu0  ;;  %835 = vtanh.f32 %v230_v25 }
  0xfc   :  { %v234_v30 = vadd.f32 %v233_v29, %v98_v28  ;;  %v235_v31 = vpop.f32.mrb[15].mxu0  ;;  %767 = vmatprep.subr.bf16.mxu1 %v766_v27  ;;  %v826_v33 = vpop.eup %825 }
  0xfd   :  { %v236_v32 = vadd.f32 %v235_v31, %v98_v28  ;;  %769 = vmatpush1.bf16.msra.mxu1 %v768_v26  ;;  %v828_v34 = vpop.eup %827  ;;  %v303_v28 = vpop.permute.xlu0 %302 }
  0xfe   :  { %837 = vtanh.f32 %v234_v30 }
  0xff   :  { %839 = vtanh.f32 %v236_v32 }
 0x100   :  { %v830_v35 = vpop.eup %829 }
 0x101   :  { %v832_v36 = vpop.eup %831  ;;  %v772_v37 = vpack.c.bf16 %v830_v35, %v826_v33 }
 0x102   :  { %v770_v38 = vpack.c.bf16 %v832_v36, %v828_v34 }
 0x104   :  { %771 = vmatprep.subr.bf16.mxu1 %v770_v38  ;;  %v834_v39 = vpop.eup %833 }
 0x105   :  { %773 = vmatpush1.bf16.msra.mxu1 %v772_v37  ;;  %v836_v40 = vpop.eup %835  ;;  %v308_v37 = vpop.permute.xlu1 %307 }
 0x108   :  { %v838_v41 = vpop.eup %837 }
 0x109   :  { %v840_v42 = vpop.eup %839  ;;  %v776_v43 = vpack.c.bf16 %v838_v41, %v834_v39 }
 0x10a   :  { %v774_v44 = vpack.c.bf16 %v840_v42, %v836_v40 }
 0x10c   :  { %775 = vmatprep.subr.bf16.mxu1 %v774_v44 }
 0x10d   :  { %777 = vmatpush1.bf16.msra.mxu1 %v776_v43 }
 0x110   :  { %740 = vmatmul.mubr.msk.f32.vlgmr.msra.gmra.mrb[0].mxu1 %vm310_vm1, %v254_v45 }
 0x111   :  { %405 = vmatprep.mubr.f32.mxu1 %v917_v7 }
 0x114   :  { %741 = vmatmul.mubr.msk.f32.gmra.mrb[2].mxu1 %vm310_vm1, %v255_v46 }
 0x115   :  { %411 = vmatprep.mubr.f32.mxu1 %v917_v7 }
 0x118   :  { %742 = vmatmul.mubr.msk.f32.gmra.mrb[4].mxu1 %vm310_vm1, %v256_v47 }
 0x119   :  { %417 = vmatprep.mubr.f32.mxu1 %v917_v7 }
 0x11c   :  { %743 = vmatmul.mubr.msk.f32.gmra.mrb[6].mxu1 %vm310_vm1, %v257_v48 }
 0x11d   :  { %423 = vmatprep.mubr.f32.mxu1 %v917_v7 }
 0x120   :  { %744 = vmatmul.mubr.msk.f32.gmra.mrb[8].mxu1 %vm310_vm1, %v258_v49 }
 0x121   :  { %429 = vmatprep.mubr.f32.mxu1 %v917_v7 }
 0x124   :  { %745 = vmatmul.mubr.msk.f32.gmra.mrb[10].mxu1 %vm310_vm1, %v259_v50 }
 0x125   :  { %435 = vmatprep.mubr.f32.mxu1 %v917_v7 }
 0x128   :  { %746 = vmatmul.mubr.msk.f32.gmra.mrb[12].mxu1 %vm310_vm1, %v260_v51 }
 0x129   :  { %441 = vmatprep.mubr.f32.mxu1 %v917_v7 }
 0x12c   :  { %747 = vmatmul.mubr.msk.f32.gmra.mrb[14].mxu1 %vm310_vm1, %v261_v52 }
 0x12d   :  { %685 = vmatprep.mubr.f32.mxu1 %v917_v7 }
 0x1e3   :  { %v401_v54 = vpop.f32.mrb[0].mxu1 }
 0x1e4   :  { %v402_v55 = vadd.f32 %v401_v54, %v273_v53  ;;  %v403_v56 = vpop.f32.mrb[1].mxu1  ;;  %v464_v54 = vld [vmem:[%s1200_s5] sm:$0xff] }
 0x1e5   :  { %v404_v57 = vadd.f32 %v403_v56, %v273_v53  ;;  %v466_v56 = vld [vmem:[%s1200_s5 + $0x10] sm:$0xff] }
 0x1e6   :  { %841 = vtanh.f32 %v402_v55  ;;  %v465_v55 = vld [vmem:[%s1200_s5 + $0x8] sm:$0xff] }
 0x1e7   :  { %v407_v59 = vpop.f32.mrb[2].mxu1  ;;  %843 = vtanh.f32 %v404_v57  ;;  %v467_v57 = vld [vmem:[%s1200_s5 + $0x18] sm:$0xff] }
 0x1e8   :  { %v408_v60 = vadd.f32 %v407_v59, %v278_v58  ;;  %v409_v61 = vpop.f32.mrb[3].mxu1 }
 0x1e9   :  { %v410_v62 = vadd.f32 %v409_v61, %v278_v58  ;;  %v475_v58 = vpop.permute.xlu0 %474 }
 0x1ea   :  { %845 = vtanh.f32 %v408_v60 }
 0x1eb   :  { %847 = vtanh.f32 %v410_v62  ;;  %v413_v0 = vpop.f32.mrb[4].mxu1 }
 0x1ec   :  { %v414_v1 = vadd.f32 %v413_v0, %v283_v63  ;;  %v415_v2 = vpop.f32.mrb[5].mxu1 }
 0x1ed   :  { %v416_v3 = vadd.f32 %v415_v2, %v283_v63  ;;  %v480_v63 = vpop.permute.xlu1 %479 }
 0x1ee   :  { %849 = vtanh.f32 %v414_v1 }
 0x1ef   :  { %v419_v5 = vpop.f32.mrb[6].mxu1  ;;  %851 = vtanh.f32 %v416_v3 }
 0x1f0   :  { %v420_v6 = vadd.f32 %v419_v5, %v288_v4  ;;  %v421_v8 = vpop.f32.mrb[7].mxu1  ;;  %v842_v10 = vpop.eup %841 }
 0x1f1   :  { %v422_v9 = vadd.f32 %v421_v8, %v288_v4  ;;  %v844_v11 = vpop.eup %843  ;;  %v485_v4 = vpop.permute.xlu0 %484 }
 0x1f2   :  { %853 = vtanh.f32 %v420_v6 }
 0x1f3   :  { %855 = vtanh.f32 %v422_v9  ;;  %v425_v13 = vpop.f32.mrb[8].mxu1 }
 0x1f4   :  { %v846_v14 = vpop.eup %845  ;;  %v426_v15 = vadd.f32 %v425_v13, %v293_v12  ;;  %v427_v16 = vpop.f32.mrb[9].mxu1 }
 0x1f5   :  { %v848_v17 = vpop.eup %847  ;;  %v428_v18 = vadd.f32 %v427_v16, %v293_v12  ;;  %v780_v19 = vpack.c.bf16 %v846_v14, %v842_v10  ;;  %v490_v10 = vpop.permute.xlu1 %489 }
 0x1f6   :  { %v778_v20 = vpack.c.bf16 %v848_v17, %v844_v11  ;;  %857 = vtanh.f32 %v426_v15 }
 0x1f7   :  { %v431_v22 = vpop.f32.mrb[10].mxu1  ;;  %859 = vtanh.f32 %v428_v18 }
 0x1f8   :  { %v432_v23 = vadd.f32 %v431_v22, %v298_v21  ;;  %v433_v24 = vpop.f32.mrb[11].mxu1  ;;  %779 = vmatprep.subr.bf16.mxu0 %v778_v20  ;;  %v850_v26 = vpop.eup %849 }
 0x1f9   :  { %v434_v25 = vadd.f32 %v433_v24, %v298_v21  ;;  %781 = vmatpush1.bf16.msra.mxu0 %v780_v19  ;;  %v852_v27 = vpop.eup %851 }
 0x1fa   :  { %861 = vtanh.f32 %v432_v23 }
 0x1fb   :  { %863 = vtanh.f32 %v434_v25  ;;  %v437_v29 = vpop.f32.mrb[12].mxu1 }
 0x1fc   :  { %v854_v30 = vpop.eup %853  ;;  %v438_v31 = vadd.f32 %v437_v29, %v303_v28  ;;  %v439_v32 = vpop.f32.mrb[13].mxu1 }
 0x1fd   :  { %v856_v33 = vpop.eup %855  ;;  %v440_v34 = vadd.f32 %v439_v32, %v303_v28  ;;  %v784_v35 = vpack.c.bf16 %v854_v30, %v850_v26  ;;  %v602_v28 = vld [vmem:[%s1202_s7 + $0x8] sm:$0xff]  ;;  %v608_v29 = vpop.permute.xlu1 %607 }
 0x1fe   :  { %v782_v36 = vpack.c.bf16 %v856_v33, %v852_v27  ;;  %865 = vtanh.f32 %v438_v31  ;;  %v601_v27 = vld [vmem:[%s1202_s7] sm:$0xff] }
 0x1ff   :  { %v443_v38 = vpop.f32.mrb[14].mxu1  ;;  %867 = vtanh.f32 %v440_v34  ;;  %v613_v34 = vpop.permute.xlu0 %612 }
 0x200   :  { %v444_v39 = vadd.f32 %v443_v38, %v308_v37  ;;  %v445_v40 = vpop.f32.mrb[15].mxu1  ;;  %783 = vmatprep.subr.bf16.mxu0 %v782_v36  ;;  %v858_v42 = vpop.eup %857 }
 0x201   :  { %v446_v41 = vadd.f32 %v445_v40, %v308_v37  ;;  %785 = vmatpush1.bf16.msra.mxu0 %v784_v35  ;;  %v860_v43 = vpop.eup %859 }
 0x202   :  { %869 = vtanh.f32 %v444_v39 }
 0x203   :  { %871 = vtanh.f32 %v446_v41  ;;  %v704_v41 = vld [vmem:[%s1204_s9] sm:$0xff] }
 0x204   :  { %v862_v44 = vpop.eup %861 }
 0x205   :  { %v864_v45 = vpop.eup %863  ;;  %v788_v46 = vpack.c.bf16 %v862_v44, %v858_v42  ;;  %v705_v44 = vld [vmem:[%s1204_s9 + $0x8] sm:$0xff] }
 0x206   :  { %v786_v47 = vpack.c.bf16 %v864_v45, %v860_v43 }
 0x208   :  { %787 = vmatprep.subr.bf16.mxu0 %v786_v47  ;;  %v866_v48 = vpop.eup %865 }
 0x209   :  { %789 = vmatpush1.bf16.msra.mxu0 %v788_v46  ;;  %v868_v49 = vpop.eup %867 }
 0x20c   :  { %v870_v50 = vpop.eup %869 }
 0x20d   :  { %v872_v51 = vpop.eup %871  ;;  %v792_v52 = vpack.c.bf16 %v870_v50, %v866_v48 }
 0x20e   :  { %v790_v53 = vpack.c.bf16 %v872_v51, %v868_v49 }
 0x210   :  { %791 = vmatprep.subr.bf16.mxu0 %v790_v53 }
 0x211   :  { %793 = vmatpush1.bf16.msra.mxu0 %v792_v52 }
 0x214   :  { %748 = vmatmul.mubr.msk.f32.vlgmr.msra.gmra.mrb[16].mxu0 %vm310_vm1, %v464_v54 }
 0x215   :  { %574 = vmatprep.mubr.f32.mxu0 %v917_v7 }
 0x218   :  { %749 = vmatmul.mubr.msk.f32.gmra.mrb[18].mxu0 %vm310_vm1, %v465_v55 }
 0x219   :  { %580 = vmatprep.mubr.f32.mxu0 %v917_v7 }
 0x21c   :  { %750 = vmatmul.mubr.msk.f32.gmra.mrb[20].mxu0 %vm310_vm1, %v466_v56 }
 0x21d   :  { %586 = vmatprep.mubr.f32.mxu0 %v917_v7 }
 0x220   :  { %751 = vmatmul.mubr.msk.f32.gmra.mrb[22].mxu0 %vm310_vm1, %v467_v57 }
 0x2e7   :  { %v570_v59 = vpop.f32.mrb[16].mxu0 }
 0x2e8   :  { %v571_v60 = vadd.f32 %v570_v59, %v475_v58  ;;  %v572_v61 = vpop.f32.mrb[17].mxu0 }
 0x2e9   :  { %v573_v62 = vadd.f32 %v572_v61, %v475_v58 }
 0x2ea   :  { %873 = vtanh.f32 %v571_v60 }
 0x2eb   :  { %v576_v0 = vpop.f32.mrb[18].mxu0  ;;  %875 = vtanh.f32 %v573_v62 }
 0x2ec   :  { %v577_v1 = vadd.f32 %v576_v0, %v480_v63  ;;  %v578_v2 = vpop.f32.mrb[19].mxu0 }
 0x2ed   :  { %v579_v3 = vadd.f32 %v578_v2, %v480_v63 }
 0x2ee   :  { %877 = vtanh.f32 %v577_v1 }
 0x2ef   :  { %879 = vtanh.f32 %v579_v3  ;;  %v582_v5 = vpop.f32.mrb[20].mxu0 }
 0x2f0   :  { %v583_v6 = vadd.f32 %v582_v5, %v485_v4  ;;  %v584_v8 = vpop.f32.mrb[21].mxu0 }
 0x2f1   :  { %v585_v9 = vadd.f32 %v584_v8, %v485_v4 }
 0x2f2   :  { %881 = vtanh.f32 %v583_v6 }
 0x2f3   :  { %v588_v11 = vpop.f32.mrb[22].mxu0  ;;  %883 = vtanh.f32 %v585_v9 }
 0x2f4   :  { %v589_v12 = vadd.f32 %v588_v11, %v490_v10  ;;  %v590_v13 = vpop.f32.mrb[23].mxu0  ;;  %v874_v15 = vpop.eup %873 }
 0x2f5   :  { %v591_v14 = vadd.f32 %v590_v13, %v490_v10  ;;  %v876_v16 = vpop.eup %875 }
 0x2f6   :  { %885 = vtanh.f32 %v589_v12 }
 0x2f7   :  { %887 = vtanh.f32 %v591_v14 }
 0x2f8   :  { %v878_v17 = vpop.eup %877 }
 0x2f9   :  { %v880_v18 = vpop.eup %879  ;;  %v796_v19 = vpack.c.bf16 %v878_v17, %v874_v15 }
 0x2fa   :  { %v794_v20 = vpack.c.bf16 %v880_v18, %v876_v16 }
 0x2fc   :  { %795 = vmatprep.subr.bf16.mxu1 %v794_v20  ;;  %v882_v21 = vpop.eup %881 }
 0x2fd   :  { %797 = vmatpush1.bf16.msra.mxu1 %v796_v19  ;;  %v884_v22 = vpop.eup %883 }
 0x300   :  { %v886_v23 = vpop.eup %885 }
 0x301   :  { %v888_v24 = vpop.eup %887  ;;  %v800_v25 = vpack.c.bf16 %v886_v23, %v882_v21 }
 0x302   :  { %v798_v26 = vpack.c.bf16 %v888_v24, %v884_v22 }
 0x304   :  { %799 = vmatprep.subr.bf16.mxu1 %v798_v26 }
 0x305   :  { %801 = vmatpush1.bf16.msra.mxu1 %v800_v25 }
 0x308   :  { %752 = vmatmul.mubr.msk.f32.vlgmr.msra.gmra.mrb[16].mxu1 %vm100_vm0, %v601_v27 }
 0x309   :  { %691 = vmatprep.mubr.f32.mxu1 %v917_v7 }
 0x30c   :  { %753 = vmatmul.mubr.msk.f32.gmra.mrb[18].mxu1 %vm100_vm0, %v602_v28 }
 0x3db   :  { %v687_v30 = vpop.f32.mrb[16].mxu1 }
 0x3dc   :  { %v688_v31 = vadd.f32 %v687_v30, %v608_v29  ;;  %v689_v32 = vpop.f32.mrb[17].mxu1 }
 0x3dd   :  { %v690_v33 = vadd.f32 %v689_v32, %v608_v29 }
 0x3de   :  { %712 = vst [vmem:[#allocation2 + $0x10] sm:$0xff] %v688_v31 }
 0x3df   :  { %713 = vst [vmem:[#allocation2 + $0x18] sm:$0xff] %v690_v33  ;;  %v693_v35 = vpop.f32.mrb[18].mxu1 }
 0x3e0   :  { %v694_v36 = vadd.f32 %v693_v35, %v613_v34  ;;  %v695_v37 = vpop.f32.mrb[19].mxu1 }
 0x3e1   :  { %v696_v38 = vadd.f32 %v695_v37, %v613_v34 }
 0x3e2   :  { %v698_v39 = vmul.f32 1.442695, %v694_v36  ;;  %714 = vst [vmem:[#allocation2 + $0x20] sm:$0xff] %v694_v36 }
 0x3e3   :  { %v700_v7 = vmul.f32 1.442695, %v696_v38  ;;  %715 = vst [vmem:[#allocation2 + $0x28] sm:$0xff] %v696_v38 }
 0x3e4   :  { %889 = vpow2.f32 %v698_v39 }
 0x3e5   :  { %891 = vpow2.f32 %v700_v7 }
 0x3ee   :  { %v890_v40 = vpop.eup %889 }
 0x3ef   :  { %v892_v42 = vpop.eup %891  ;;  %v702_v43 = vmul.f32 0.5, %v890_v40 }
 0x3f0   :  { %v703_v45 = vmul.f32 0.5, %v892_v42 }
 0x3f1   :  { %v706_v46 = vmul.f32 %v704_v41, %v702_v43 }
 0x3f2   :  { %v707_v47 = vmul.f32 %v705_v44, %v703_v45 }
 0x3f3   :  { %v708_v48 = vadd.f32 %v706_v46, %v688_v31 }
 0x3f4   :  { %v709_v49 = vadd.f32 %v707_v47, %v690_v33 }
 0x3f5   :  { %710 = vst [vmem:[#allocation2] sm:$0xff] %v708_v48 }
 0x3f6   :  { %711 = vst [vmem:[#allocation2 + $0x8] sm:$0xff] %v709_v49 }
 0x3f7   :  { %904 = shalt.err (!%p901_p4)
}
 0x3f8   :  { %s905_s9 = scalar_lea.hbm %s1205_s10, 768 }
 0x3f9   :  { %p906_p5 = scmp.ne.s32.totalorder %s1205_s10, %s905_s9  ;;  %p909_p6 = scmp.lt.u32.totalorder %s905_s9, %s1205_s10 }
 0x3fb   :  { %p911_p7 = pnand %p909_p6, %p906_p5 }
 0x3fd   :  { %914 = shalt.err (!%p911_p7)
}
 0x3fe   :  { %s920_s12 = smov 256   ;;  %s921_s13 = smov 16  }
 0x3ff   :  { %727 = dma.vmem_to_hbm [thread:$0]  %s722_s24, 768, %s1205_s10, [#allocation3], %s920_s12, %s920_s12, %s921_s13  }
 0x400   :  { %915 = dma.done.wait [#allocation3], 768  }
 0x401   :  { %916 = vsyncadd [#allocation3], 4294966528 }
 0x402   :  { %731 = vsyncpa [#allocation3], 1 }

</bundles_post_ra>
